<compile_context>
chip_gen: v6e
topology: v6e:2x2x1
jax: 0.10.0
libtpu: 0.0.40
codegen_flags: <defaults>
</compile_context>

<pallas_src>
import functools

import jax
import jax.numpy as jnp
from jax.experimental import pallas as pl
from jax.experimental.pallas import tpu as pltpu


def _round_up(x, m):
    return ((x + m - 1) // m) * m


def _mha_pool_kernel(q_ref, k_ref, wq_ref, bq_ref, wk_ref, bk_ref, wv_ref,
                     bv_ref, sel_ref, selt_ref, out_ref, attn_ref,
                     *, n_head, d_k, d_v, tb, l_pad, l_valid):
    """Process one batch tile (TB rows) per grid step.

    q_ref:    (TB, Dq)            bf16
    k_ref:    (TB, Lp, Dko)       bf16
    wq_ref:   (Dq, H*dk)  bf16    bq_ref: (1, H*dk)  f32
    wk_ref:   (Dko, H*dk) bf16    bk_ref: (1, H*dk)  f32
    wv_ref:   (Dko, H*dv) bf16    bv_ref: (1, H*dv)  f32
    sel_ref:  (H*dk, H)   f32  head selector scaled by 1/temperature
    selt_ref: (H, H*dv)   f32  0/1 broadcast of per-head attn over dv slots
    out_ref:  (TB, H*dv)  f32
    attn_ref: (TB, Lp, H) f32  natural layout (sublane=L, lane=H)
    """
    H, dk, dv, Lp = n_head, d_k, d_v, l_pad

    q = q_ref[...]                                          # (TB, Dq)      bf16
    k2 = k_ref[...].reshape(tb * Lp, k_ref.shape[-1])       # (TB*Lp, Dko)  bf16

    # Projections on the MXU (bf16 inputs, f32 accumulation), biases added in f32.
    qs = jnp.dot(q, wq_ref[...], preferred_element_type=jnp.float32) + bq_ref[...]    # (TB, H*dk)
    ks = jnp.dot(k2, wk_ref[...], preferred_element_type=jnp.float32) + bk_ref[...]   # (TB*Lp, H*dk)
    vs = jnp.dot(k2, wv_ref[...], preferred_element_type=jnp.float32) + bv_ref[...]   # (TB*Lp, H*dv)

    # Per-head scores for all rows/heads at once.  sel already carries 1/temp:
    #   scores[b, l, h] = inv_temp * sum_d qs[b, h*dk+d] * ks[b*Lp+l, h*dk+d]
    prod = ks.reshape(tb, Lp, H * dk) * qs[:, None, :]                      # (TB, Lp, H*dk) f32
    scores = jnp.dot(prod.reshape(tb * Lp, H * dk), sel_ref[...],
                     preferred_element_type=jnp.float32).reshape(tb, Lp, H)  # (TB, Lp, H)

    if l_valid < Lp:  # mask sequence padding (compile-time constant mask)
        pos = jax.lax.broadcasted_iota(jnp.int32, (1, Lp, 1), 1)
        scores = jnp.where(pos < l_valid, scores, -jnp.inf)

    # Softmax over L for every head simultaneously (exact normalisation so the
    # returned attention rows sum to 1).
    m = jnp.max(scores, axis=1, keepdims=True)              # (TB, 1, H)
    e = jnp.exp(scores - m)                                 # (TB, Lp, H)
    attn = e / jnp.sum(e, axis=1, keepdims=True)            # (TB, Lp, H)

    # Pooled output: out[b, h*dv+d] = sum_l attn[b,l,h] * vs[b*Lp+l, h*dv+d]
    w = jnp.dot(attn.reshape(tb * Lp, H), selt_ref[...],
                preferred_element_type=jnp.float32)         # (TB*Lp, H*dv)
    out_ref[...] = jnp.sum((w * vs).reshape(tb, Lp, H * dv), axis=1)   # (TB, H*dv)

    # Attention kept in its natural layout; no in-kernel relayout.  The
    # reference (H*B, L) layout is produced by a cheap wrapper-side transpose.
    attn_ref[...] = attn


def _vmem_capacity_bytes():
    try:
        info = pltpu.get_tpu_info()
        return int(getattr(info, "vmem_capacity_bytes", 64 * 1024 * 1024))
    except Exception:
        return 64 * 1024 * 1024


def _select_batch_tile(B, Lp, Dko, Dq, H, d_k, d_v, vmem_limit):
    """Batch tile: big enough to amortise per-step overhead, small enough that
    the double-buffered bf16 k tile + f32 intermediates fit the per-generation
    VMEM budget, >= 2 grid steps when B allows it (v7x megacore), and limited
    batch-padding waste for ragged batch sizes."""
    row = (2 * Lp * Dko * 2                                    # k tile, 2 pipeline buffers, bf16
           + Lp * (3 * H * d_k + 3 * H * d_v + 4 * H) * 4      # ks/prod + vs/weighted + scores/e/attn
           + (2 * Dq + 2 * H * d_k + 2 * H * d_v) * 4)         # q row, qs, pooled out (generous)
    budget = vmem_limit // 2                                    # headroom for weights / spills
    tb = budget // max(row, 1)
    tb = max(8, min(512, (tb // 8) * 8))
    tb = min(tb, _round_up(B, 8))
    if B >= 16 and _round_up(B, tb) // tb < 2:                  # keep both v7x TCs busy
        tb = max(8, (_round_up(B, 8) // 2 // 8) * 8)
    while tb > 8 and (_round_up(B, tb) - B) * 2 > tb:           # limit padding waste
        tb -= 8
    return tb


def multihead_att_pool(q, k, params, n_head, *, block_b=None):
    B, Dq = q.shape
    Bk, L, Dko = k.shape
    assert Bk == B
    assert Dko % n_head == 0
    d_k = Dko // n_head
    d_v = d_k
    wq, bq, wk, bk, wv, bv = params
    # Guard the fused/selector construction against mismatched head dims.
    assert wq.shape == (Dq, n_head * d_k)
    assert wk.shape == (Dko, n_head * d_k)
    assert wv.shape == (Dko, n_head * d_v)
    inv_temp = 1.0 / (float(d_k) ** 0.5)

    # Head selectors, built once at trace time.  `sel` folds in 1/temperature
    # (score scaling); `selt` broadcasts per-head attention over the dv slots.
    head_k = jnp.arange(n_head * d_k) // d_k
    head_v = jnp.arange(n_head * d_v) // d_v
    heads = jnp.arange(n_head)
    sel = (head_k[:, None] == heads[None, :]).astype(jnp.float32) * inv_temp   # (H*dk, H)
    selt = (heads[:, None] == head_v[None, :]).astype(jnp.float32)             # (H, H*dv)

    # bf16 MXU inputs (f32 accumulation inside the kernel); biases stay f32.
    q_bf = q.astype(jnp.bfloat16)
    k_bf = k.astype(jnp.bfloat16)
    wq_bf = wq.astype(jnp.bfloat16)
    wk_bf = wk.astype(jnp.bfloat16)
    wv_bf = wv.astype(jnp.bfloat16)
    bq32 = bq.astype(jnp.float32).reshape(1, n_head * d_k)
    bk32 = bk.astype(jnp.float32).reshape(1, n_head * d_k)
    bv32 = bv.astype(jnp.float32).reshape(1, n_head * d_v)

    # Pad L to a sublane multiple so the in-kernel reshapes stay free views;
    # the padded positions are masked to -inf inside the kernel.
    Lp = _round_up(L, 8)
    if Lp != L:
        k_bf = jnp.pad(k_bf, ((0, 0), (0, Lp - L), (0, 0)))

    vmem_cap = _vmem_capacity_bytes()
    vmem_limit = max(int(min(0.7 * vmem_cap, 100 * 1024 * 1024)), 32 * 1024 * 1024)

    tb = block_b if block_b is not None else _select_batch_tile(
        B, Lp, Dko, Dq, n_head, d_k, d_v, vmem_limit)
    B_pad = _round_up(B, tb)
    if B_pad != B:
        q_bf = jnp.pad(q_bf, ((0, B_pad - B), (0, 0)))
        k_bf = jnp.pad(k_bf, ((0, B_pad - B), (0, 0), (0, 0)))

    kernel = functools.partial(
        _mha_pool_kernel, n_head=n_head, d_k=d_k, d_v=d_v,
        tb=tb, l_pad=Lp, l_valid=L)

    out_shapes = (
        jax.ShapeDtypeStruct((B_pad, n_head * d_v), jnp.float32),
        jax.ShapeDtypeStruct((B_pad, Lp, n_head), jnp.float32),
    )
    grid_spec = pltpu.PrefetchScalarGridSpec(
        num_scalar_prefetch=0,
        grid=(B_pad // tb,),
        in_specs=[
            pl.BlockSpec((tb, Dq), lambda i: (i, 0)),
            pl.BlockSpec((tb, Lp, Dko), lambda i: (i, 0, 0)),
            # NOTE: the constant-index weight/bias/selector inputs below could
            # be single-buffered (pipeline_mode=pl.Buffered(1)) to save VMEM on
            # v7x; left at the default for compatibility.
            pl.BlockSpec((Dq, n_head * d_k), lambda i: (0, 0)),
            pl.BlockSpec((1, n_head * d_k), lambda i: (0, 0)),
            pl.BlockSpec((Dko, n_head * d_k), lambda i: (0, 0)),
            pl.BlockSpec((1, n_head * d_k), lambda i: (0, 0)),
            pl.BlockSpec((Dko, n_head * d_v), lambda i: (0, 0)),
            pl.BlockSpec((1, n_head * d_v), lambda i: (0, 0)),
            pl.BlockSpec((n_head * d_k, n_head), lambda i: (0, 0)),
            pl.BlockSpec((n_head, n_head * d_v), lambda i: (0, 0)),
        ],
        out_specs=[
            pl.BlockSpec((tb, n_head * d_v), lambda i: (i, 0)),
            pl.BlockSpec((tb, Lp, n_head), lambda i: (i, 0, 0)),
        ],
    )
    out, attn3 = pl.pallas_call(
        kernel,
        out_shape=out_shapes,
        grid_spec=grid_spec,
        compiler_params=pltpu.CompilerParams(
            dimension_semantics=("parallel",),
            vmem_limit_bytes=vmem_limit,
        ),
    )(q_bf, k_bf, wq_bf, bq32, wk_bf, bk32, wv_bf, bv32, sel, selt)

    out = out[:B]
    # attn3[b, l, h]  ->  reference layout (H*B, L) with row = h*B + b.
    attn = jnp.transpose(attn3[:B, :L, :], (2, 0, 1)).reshape(n_head * B, L)
    return out, attn


def multihead_att_pool_ref(q, k, params, n_head, *, matmul_dtype=jnp.float32):
    """Pure-JAX reference mirroring the PyTorch module exactly (eval mode).
    With matmul_dtype=bfloat16 it emulates the kernel's mixed-precision matmuls."""
    B, Dq = q.shape
    _, L, Dko = k.shape
    d_k = Dko // n_head
    d_v = d_k
    wq, bq, wk, bk, wv, bv = params
    qm = q.astype(matmul_dtype)
    km = k.astype(matmul_dtype).reshape(B * L, Dko)
    qs = jnp.dot(qm, wq.astype(matmul_dtype), preferred_element_type=jnp.float32) + bq
    ks = jnp.dot(km, wk.astype(matmul_dtype), preferred_element_type=jnp.float32) + bk
    vs = jnp.dot(km, wv.astype(matmul_dtype), preferred_element_type=jnp.float32) + bv
    qs = qs.reshape(B, n_head, d_k)
    ks = ks.reshape(B, L, n_head, d_k)
    vs = vs.reshape(B, L, n_head, d_v)
    qs = jnp.transpose(qs, (1, 0, 2)).reshape(n_head * B, d_k)
    ks = jnp.transpose(ks, (2, 0, 1, 3)).reshape(n_head * B, L, d_k)
    vs = jnp.transpose(vs, (2, 0, 1, 3)).reshape(n_head * B, L, d_v)
    attn = jnp.sum(qs[:, None, :] * ks, axis=2) / (d_k ** 0.5)
    attn = jax.nn.softmax(attn, axis=1)
    output = jnp.sum(attn[:, :, None] * vs, axis=1)              # (H*B, dv)
    output = output.reshape(n_head, B, d_v)
    output = jnp.transpose(output, (1, 0, 2)).reshape(B, n_head * d_v)
    return output, attn


if __name__ == "__main__":
    # Small shapes consistent with the module: b=2, d_q_original=32,
    # d_k_original=32, n_head=4 (=> d_k=d_v=8), seq len l=8.
    B, Dq, Dko, H, L = 2, 32, 32, 4, 8
    d_k = Dko // H
    d_v = d_k

    key = jax.random.PRNGKey(0)
    k_q, k_k, k_wq, k_wk, k_wv, k_bq, k_bk, k_bv = jax.random.split(key, 8)

    q = jax.random.normal(k_q, (B, Dq), dtype=jnp.float32)
    kk = jax.random.normal(k_k, (B, L, Dko), dtype=jnp.float32)

    # Parameter init mirroring the module's __init__ (weights stored as (in, out)).
    wq = (jax.random.normal(k_wq, (Dq, H * d_k)) * (2.0 / (Dq + d_k)) ** 0.5).astype(jnp.float32)
    wk = (jax.random.normal(k_wk, (Dko, H * d_k)) * (2.0 / (Dko + d_k)) ** 0.5).astype(jnp.float32)
    wv = (jax.random.normal(k_wv, (Dko, H * d_v)) * (2.0 / (Dko + d_v)) ** 0.5).astype(jnp.float32)
    bq = (jax.random.uniform(k_bq, (1, H * d_k), minval=-1, maxval=1) / (Dq ** 0.5)).astype(jnp.float32)
    bk = (jax.random.uniform(k_bk, (1, H * d_k), minval=-1, maxval=1) / (Dko ** 0.5)).astype(jnp.float32)
    bv = (jax.random.uniform(k_bv, (1, H * d_v), minval=-1, maxval=1) / (Dko ** 0.5)).astype(jnp.float32)

    params = (wq, bq, wk, bk, wv, bv)

    out, attn = multihead_att_pool(q, kk, params, H)
    out = jax.block_until_ready(out)
    attn = jax.block_until_ready(attn)

    assert out.shape == (B, H * d_v)
    assert attn.shape == (H * B, L)

    # Tight check against a reference that emulates the same bf16-input /
    # f32-accumulation matmuls.
    out_bf, attn_bf = multihead_att_pool_ref(q, kk, params, H, matmul_dtype=jnp.bfloat16)
    assert jnp.allclose(attn, attn_bf, atol=2e-3, rtol=2e-3)
    assert jnp.allclose(out, out_bf, atol=2e-3, rtol=2e-3)

    # Loose semantics sanity check against the full-f32 module math (tolerance
    # accounts for bf16 MXU inputs).
    out_f32, attn_f32 = multihead_att_pool_ref(q, kk, params, H, matmul_dtype=jnp.float32)
    assert jnp.allclose(attn, attn_f32, atol=1e-1, rtol=1e-1)
    assert jnp.allclose(out, out_f32, atol=1e-1, rtol=1e-1)

    print("KERNEL_OK")
</pallas_src>

<mosaic_0001>
module attributes {stable_mosaic.version = 11 : i64} {
  func.func @_mha_pool_kernel(%arg0: i32, %arg1: memref<8x32xbf16, #tpu.memory_space<vmem>>, %arg2: memref<8x8x32xbf16, #tpu.memory_space<vmem>>, %arg3: memref<32x32xbf16, #tpu.memory_space<vmem>>, %arg4: memref<1x32xf32, #tpu.memory_space<vmem>>, %arg5: memref<32x32xbf16, #tpu.memory_space<vmem>>, %arg6: memref<1x32xf32, #tpu.memory_space<vmem>>, %arg7: memref<32x32xbf16, #tpu.memory_space<vmem>>, %arg8: memref<1x32xf32, #tpu.memory_space<vmem>>, %arg9: memref<32x4xf32, #tpu.memory_space<vmem>>, %arg10: memref<4x32xf32, #tpu.memory_space<vmem>>, %arg11: memref<8x32xf32, #tpu.memory_space<vmem>>, %arg12: memref<8x8x4xf32, #tpu.memory_space<vmem>>) attributes {dimension_semantics = [#tpu.dimension_semantics<parallel>], iteration_bounds = array<i64: 1>, scalar_prefetch = 0 : i64, scratch_operands = 0 : i64, tpu.core_type = #tpu.core_type<tc>, window_params = [{transform_indices = @transform_0, window_bounds = array<i64: 8, 32>}, {transform_indices = @transform_1, window_bounds = array<i64: 8, 8, 32>}, {pipeline_mode = #tpu.pipeline_mode<synchronous>, transform_indices = @transform_2, window_bounds = array<i64: 32, 32>}, {pipeline_mode = #tpu.pipeline_mode<synchronous>, transform_indices = @transform_3, window_bounds = array<i64: 1, 32>}, {pipeline_mode = #tpu.pipeline_mode<synchronous>, transform_indices = @transform_4, window_bounds = array<i64: 32, 32>}, {pipeline_mode = #tpu.pipeline_mode<synchronous>, transform_indices = @transform_5, window_bounds = array<i64: 1, 32>}, {pipeline_mode = #tpu.pipeline_mode<synchronous>, transform_indices = @transform_6, window_bounds = array<i64: 32, 32>}, {pipeline_mode = #tpu.pipeline_mode<synchronous>, transform_indices = @transform_7, window_bounds = array<i64: 1, 32>}, {pipeline_mode = #tpu.pipeline_mode<synchronous>, transform_indices = @transform_8, window_bounds = array<i64: 32, 4>}, {pipeline_mode = #tpu.pipeline_mode<synchronous>, transform_indices = @transform_9, window_bounds = array<i64: 4, 32>}, {transform_indices = @transform_10, window_bounds = array<i64: 8, 32>}, {transform_indices = @transform_11, window_bounds = array<i64: 8, 8, 4>}]} {
    %c0 = arith.constant 0 : index
    %c0_0 = arith.constant 0 : index
    %0 = vector.load %arg1[%c0, %c0_0] : memref<8x32xbf16, #tpu.memory_space<vmem>>, vector<8x32xbf16>
    %c0_1 = arith.constant 0 : index
    %c0_2 = arith.constant 0 : index
    %c0_3 = arith.constant 0 : index
    %1 = vector.load %arg2[%c0_1, %c0_2, %c0_3] : memref<8x8x32xbf16, #tpu.memory_space<vmem>>, vector<8x8x32xbf16>
    %2 = vector.shape_cast %1 : vector<8x8x32xbf16> to vector<64x32xbf16>
    %c0_4 = arith.constant 0 : index
    %c0_5 = arith.constant 0 : index
    %3 = vector.load %arg3[%c0_4, %c0_5] : memref<32x32xbf16, #tpu.memory_space<vmem>>, vector<32x32xbf16>
    %cst = arith.constant dense<0.000000e+00> : vector<8x32xf32>
    %4 = tpu.matmul %0, %3, %cst {dimension_numbers = #tpu.dot_dimension_numbers<[1], [0], [0], [1], [0, 0, 1, 1], [], []>} : vector<8x32xbf16>, vector<32x32xbf16>, vector<8x32xf32> -> vector<8x32xf32>
    %c0_6 = arith.constant 0 : index
    %c0_7 = arith.constant 0 : index
    %5 = vector.load %arg4[%c0_6, %c0_7] : memref<1x32xf32, #tpu.memory_space<vmem>>, vector<1x32xf32>
    %6 = vector.broadcast %5 : vector<1x32xf32> to vector<8x32xf32>
    %7 = arith.addf %4, %6 : vector<8x32xf32>
    %c0_8 = arith.constant 0 : index
    %c0_9 = arith.constant 0 : index
    %8 = vector.load %arg5[%c0_8, %c0_9] : memref<32x32xbf16, #tpu.memory_space<vmem>>, vector<32x32xbf16>
    %cst_10 = arith.constant dense<0.000000e+00> : vector<64x32xf32>
    %9 = tpu.matmul %2, %8, %cst_10 {dimension_numbers = #tpu.dot_dimension_numbers<[1], [0], [0], [1], [0, 0, 1, 1], [], []>} : vector<64x32xbf16>, vector<32x32xbf16>, vector<64x32xf32> -> vector<64x32xf32>
    %c0_11 = arith.constant 0 : index
    %c0_12 = arith.constant 0 : index
    %10 = vector.load %arg6[%c0_11, %c0_12] : memref<1x32xf32, #tpu.memory_space<vmem>>, vector<1x32xf32>
    %11 = vector.broadcast %10 : vector<1x32xf32> to vector<64x32xf32>
    %12 = arith.addf %9, %11 : vector<64x32xf32>
    %c0_13 = arith.constant 0 : index
    %c0_14 = arith.constant 0 : index
    %13 = vector.load %arg7[%c0_13, %c0_14] : memref<32x32xbf16, #tpu.memory_space<vmem>>, vector<32x32xbf16>
    %cst_15 = arith.constant dense<0.000000e+00> : vector<64x32xf32>
    %14 = tpu.matmul %2, %13, %cst_15 {dimension_numbers = #tpu.dot_dimension_numbers<[1], [0], [0], [1], [0, 0, 1, 1], [], []>} : vector<64x32xbf16>, vector<32x32xbf16>, vector<64x32xf32> -> vector<64x32xf32>
    %c0_16 = arith.constant 0 : index
    %c0_17 = arith.constant 0 : index
    %15 = vector.load %arg8[%c0_16, %c0_17] : memref<1x32xf32, #tpu.memory_space<vmem>>, vector<1x32xf32>
    %16 = vector.broadcast %15 : vector<1x32xf32> to vector<64x32xf32>
    %17 = arith.addf %14, %16 : vector<64x32xf32>
    %18 = vector.shape_cast %12 : vector<64x32xf32> to vector<8x8x32xf32>
    %19 = vector.shape_cast %7 : vector<8x32xf32> to vector<8x1x32xf32>
    %20 = vector.broadcast %19 : vector<8x1x32xf32> to vector<8x8x32xf32>
    %21 = arith.mulf %18, %20 : vector<8x8x32xf32>
    %22 = vector.shape_cast %21 : vector<8x8x32xf32> to vector<64x32xf32>
    %c0_18 = arith.constant 0 : index
    %c0_19 = arith.constant 0 : index
    %23 = vector.load %arg9[%c0_18, %c0_19] : memref<32x4xf32, #tpu.memory_space<vmem>>, vector<32x4xf32>
    %cst_20 = arith.constant dense<0.000000e+00> : vector<64x4xf32>
    %24 = tpu.matmul %22, %23, %cst_20 {dimension_numbers = #tpu.dot_dimension_numbers<[1], [0], [0], [1], [0, 0, 1, 1], [], []>} : vector<64x32xf32>, vector<32x4xf32>, vector<64x4xf32> -> vector<64x4xf32>
    %25 = vector.shape_cast %24 : vector<64x4xf32> to vector<8x8x4xf32>
    %cst_21 = arith.constant dense<0xFF800000> : vector<8x4xf32>
    %26 = vector.multi_reduction <maximumf>, %25, %cst_21 [1] : vector<8x8x4xf32> to vector<8x4xf32>
    %27 = vector.shape_cast %26 : vector<8x4xf32> to vector<8x1x4xf32>
    %28 = vector.broadcast %27 : vector<8x1x4xf32> to vector<8x8x4xf32>
    %29 = arith.subf %25, %28 : vector<8x8x4xf32>
    %30 = math.exp %29 : vector<8x8x4xf32>
    %cst_22 = arith.constant dense<0.000000e+00> : vector<8x4xf32>
    %31 = vector.multi_reduction <add>, %30, %cst_22 [1] : vector<8x8x4xf32> to vector<8x4xf32>
    %32 = vector.shape_cast %31 : vector<8x4xf32> to vector<8x1x4xf32>
    %33 = vector.broadcast %32 : vector<8x1x4xf32> to vector<8x8x4xf32>
    %34 = arith.divf %30, %33 : vector<8x8x4xf32>
    %35 = vector.shape_cast %34 : vector<8x8x4xf32> to vector<64x4xf32>
    %c0_23 = arith.constant 0 : index
    %c0_24 = arith.constant 0 : index
    %36 = vector.load %arg10[%c0_23, %c0_24] : memref<4x32xf32, #tpu.memory_space<vmem>>, vector<4x32xf32>
    %cst_25 = arith.constant dense<0.000000e+00> : vector<64x32xf32>
    %37 = tpu.matmul %35, %36, %cst_25 {dimension_numbers = #tpu.dot_dimension_numbers<[1], [0], [0], [1], [0, 0, 1, 1], [], []>} : vector<64x4xf32>, vector<4x32xf32>, vector<64x32xf32> -> vector<64x32xf32>
    %38 = arith.mulf %37, %17 : vector<64x32xf32>
    %39 = vector.shape_cast %38 : vector<64x32xf32> to vector<8x8x32xf32>
    %cst_26 = arith.constant dense<0.000000e+00> : vector<8x32xf32>
    %40 = vector.multi_reduction <add>, %39, %cst_26 [1] : vector<8x8x32xf32> to vector<8x32xf32>
    %c0_27 = arith.constant 0 : index
    %c0_28 = arith.constant 0 : index
    %41 = vector.load %arg11[%c0_27, %c0_28] : memref<8x32xf32, #tpu.memory_space<vmem>>, vector<8x32xf32>
    tpu.vector_store %arg11[%c0_27, %c0_28], %40 {strides = array<i32>} : memref<8x32xf32, #tpu.memory_space<vmem>>, vector<8x32xf32>,
    %c0_29 = arith.constant 0 : index
    %c0_30 = arith.constant 0 : index
    %c0_31 = arith.constant 0 : index
    %42 = vector.load %arg12[%c0_29, %c0_30, %c0_31] : memref<8x8x4xf32, #tpu.memory_space<vmem>>, vector<8x8x4xf32>
    tpu.vector_store %arg12[%c0_29, %c0_30, %c0_31], %34 {strides = array<i32>} : memref<8x8x4xf32, #tpu.memory_space<vmem>>, vector<8x8x4xf32>,
    return
  }
  func.func @transform_0(%arg0: i32) -> (i32, i32) {
    %c0_i32 = arith.constant 0 : i32
    %c0_i32_0 = arith.constant 0 : i32
    return %arg0, %c0_i32 : i32, i32
  }
  func.func @transform_1(%arg0: i32) -> (i32, i32, i32) {
    %c0_i32 = arith.constant 0 : i32
    %c0_i32_0 = arith.constant 0 : i32
    %c0_i32_1 = arith.constant 0 : i32
    return %arg0, %c0_i32, %c0_i32_0 : i32, i32, i32
  }
  func.func @transform_2(%arg0: i32) -> (i32, i32) {
    %c0_i32 = arith.constant 0 : i32
    %c0_i32_0 = arith.constant 0 : i32
    %c0_i32_1 = arith.constant 0 : i32
    return %c0_i32, %c0_i32_0 : i32, i32
  }
  func.func @transform_3(%arg0: i32) -> (i32, i32) {
    %c0_i32 = arith.constant 0 : i32
    %c0_i32_0 = arith.constant 0 : i32
    %c0_i32_1 = arith.constant 0 : i32
    return %c0_i32, %c0_i32_0 : i32, i32
  }
  func.func @transform_4(%arg0: i32) -> (i32, i32) {
    %c0_i32 = arith.constant 0 : i32
    %c0_i32_0 = arith.constant 0 : i32
    %c0_i32_1 = arith.constant 0 : i32
    return %c0_i32, %c0_i32_0 : i32, i32
  }
  func.func @transform_5(%arg0: i32) -> (i32, i32) {
    %c0_i32 = arith.constant 0 : i32
    %c0_i32_0 = arith.constant 0 : i32
    %c0_i32_1 = arith.constant 0 : i32
    return %c0_i32, %c0_i32_0 : i32, i32
  }
  func.func @transform_6(%arg0: i32) -> (i32, i32) {
    %c0_i32 = arith.constant 0 : i32
    %c0_i32_0 = arith.constant 0 : i32
    %c0_i32_1 = arith.constant 0 : i32
    return %c0_i32, %c0_i32_0 : i32, i32
  }
  func.func @transform_7(%arg0: i32) -> (i32, i32) {
    %c0_i32 = arith.constant 0 : i32
    %c0_i32_0 = arith.constant 0 : i32
    %c0_i32_1 = arith.constant 0 : i32
    return %c0_i32, %c0_i32_0 : i32, i32
  }
  func.func @transform_8(%arg0: i32) -> (i32, i32) {
    %c0_i32 = arith.constant 0 : i32
    %c0_i32_0 = arith.constant 0 : i32
    %c0_i32_1 = arith.constant 0 : i32
    return %c0_i32, %c0_i32_0 : i32, i32
  }
  func.func @transform_9(%arg0: i32) -> (i32, i32) {
    %c0_i32 = arith.constant 0 : i32
    %c0_i32_0 = arith.constant 0 : i32
    %c0_i32_1 = arith.constant 0 : i32
    return %c0_i32, %c0_i32_0 : i32, i32
  }
  func.func @transform_10(%arg0: i32) -> (i32, i32) {
    %c0_i32 = arith.constant 0 : i32
    %c0_i32_0 = arith.constant 0 : i32
    return %arg0, %c0_i32 : i32, i32
  }
  func.func @transform_11(%arg0: i32) -> (i32, i32, i32) {
    %c0_i32 = arith.constant 0 : i32
    %c0_i32_0 = arith.constant 0 : i32
    %c0_i32_1 = arith.constant 0 : i32
    return %arg0, %c0_i32, %c0_i32_0 : i32, i32, i32
  }
}

</mosaic_0001>

<bundles_post_ra>
// kernel: tpu_custom_call.1
= control target key start
LH: loop header
LB: loop body
LE: loop exit
PB: predicated region body
PF: predicated region fallthrough
CT: control target
= control target key end

     0   :  { %17 = vsyncpa [#allocation3], 0  ;;  %s1567_s0 = inlined_call_operand.vmem [shape: bf16[8,32], index: 0, kind: input, shape index: {}]   ;;  %s1568_s1 = inlined_call_operand.vmem [shape: bf16[8,8,32], index: 1, kind: input, shape index: {}]   ;;  %s1569_s2 = inlined_call_operand.hbm [shape: bf16[32,32], index: 2, kind: input, shape index: {}]   ;;  %s1570_s3 = inlined_call_operand.vmem [shape: f32[1,32], index: 3, kind: input, shape index: {}]   ;;  %s1571_s4 = inlined_call_operand.hbm [shape: bf16[32,32], index: 4, kind: input, shape index: {}]   ;;  %s1572_s5 = inlined_call_operand.hbm [shape: f32[1,32], index: 5, kind: input, shape index: {}]   ;;  %s1573_s6 = inlined_call_operand.hbm [shape: bf16[32,32], index: 6, kind: input, shape index: {}]   ;;  %s1574_s7 = inlined_call_operand.vmem [shape: f32[1,32], index: 7, kind: input, shape index: {}]   ;;  %s1575_s8 = inlined_call_operand.vmem [shape: f32[32,4], index: 8, kind: input, shape index: {}]   ;;  %s1576_s9 = inlined_call_operand.vmem [shape: f32[4,32], index: 9, kind: input, shape index: {}]   ;;  %s1577_s10 = inlined_call_operand.hbm [shape: f32[8,32], index: 10, kind: output, shape index: {0}]   ;;  %s1578_s11 = inlined_call_operand.vmem [shape: f32[8,8,4], index: 11, kind: output, shape index: {1}]  }
   0x1   :  { %18 = vsyncpa [#allocation6], 0 }
   0x2   :  { %19 = vsyncpa [#allocation9], 0 }
   0x3   :  { %20 = vsyncpa [#allocation4], 0  ;;  %s1314_s17 = smov [#allocation5]   ;;  %s1315_s19 = smov [#allocation2]  }
   0x4   :  { %s44_s18 = sshll.u32 %s1314_s17, 4  ;;  %s30_s20 = sshll.u32 %s1315_s19, 4  ;;  %s45_s18 = int_to_ptr.vmem [resolvable:$true] %s44_s18  ;;  %s31_s20 = int_to_ptr.vmem [resolvable:$true] %s30_s20 }
   0x5   :  { %s1214_s21 = scalar_lea.vmem %s45_s18, 256  ;;  %p1219_p1 = scmp.lt.s32.totalorder %s45_s18, %s45_s18 }
   0x6   :  { %p1215_p0 = scmp.ne.s32.totalorder %s45_s18, %s1214_s21  ;;  %p1220_p2 = scmp.lt.s32.totalorder %s1214_s21, %s1214_s21 }
   0x8   :  { %p1221_p3 = por %p1220_p2, %p1219_p1 }
   0xa   :  { %p1222_p4 = pnand %p1221_p3, %p1215_p0 }
   0xc   :  { %1225 = shalt.err (!%p1222_p4)
}
   0xd   :  { %s1316_s22 = smov 64   ;;  %s1317_s23 = smov 4  }
   0xe   :  { %50 = dma.hbm_to_vmem [thread:$0]  %s1571_s4, 256, %s45_s18, [#allocation6], %s1316_s22, %s1316_s22, %s1317_s23  }
   0xf   :  { %s1234_s26 = scalar_lea.vmem %s31_s20, 256  ;;  %p1239_p6 = scmp.lt.s32.totalorder %s31_s20, %s31_s20 }
  0x10   :  { %p1235_p5 = scmp.ne.s32.totalorder %s31_s20, %s1234_s26  ;;  %p1240_p7 = scmp.lt.s32.totalorder %s1234_s26, %s1234_s26 }
  0x12   :  { %p1241_p8 = por %p1240_p7, %p1239_p6 }
  0x14   :  { %p1242_p9 = pnand %p1241_p8, %p1235_p5 }
  0x16   :  { %1245 = shalt.err (!%p1242_p9)
}
  0x17   :  { %36 = dma.hbm_to_vmem [thread:$0]  %s1569_s2, 256, %s31_s20, [#allocation3], %s1316_s22, %s1316_s22, %s1317_s23  }
  0x18   :  { %s1318_s29 = smov [#allocation7]   ;;  %s1319_s12 = smov [#allocation8]  }
  0x19   :  { %s57_s30 = sshll.u32 %s1318_s29, 4  ;;  %s66_s13 = sshll.u32 %s1319_s12, 4  ;;  %s58_s30 = int_to_ptr.vmem [resolvable:$true] %s57_s30  ;;  %s67_s13 = int_to_ptr.vmem [resolvable:$true] %s66_s13 }
  0x1a   :  { %s1254_s4 = scalar_lea.vmem %s58_s30, 16  ;;  %s1258_s14 = scalar_lea.vmem %s58_s30, 32 }
  0x1b   :  { %p1255_p10 = scmp.ne.s32.totalorder %s58_s30, %s1254_s4  ;;  %p1259_p11 = scmp.lt.s32.totalorder %s58_s30, %s58_s30 }
  0x1c   :  { %p1260_p12 = scmp.lt.s32.totalorder %s1258_s14, %s1254_s4 }
  0x1e   :  { %p1261_p13 = por %p1260_p12, %p1259_p11 }
  0x20   :  { %p1262_p0 = pnand %p1261_p13, %p1255_p10 }
  0x22   :  { %1265 = shalt.err (!%p1262_p0)
}
  0x23   :  { %60 = dma.hbm_to_vmem [thread:$0]  %s1572_s5, 16, %s58_s30, [#allocation6]  }
  0x24   :  { %s1274_s17 = scalar_lea.vmem %s67_s13, 256  ;;  %p1279_p2 = scmp.lt.s32.totalorder %s67_s13, %s67_s13 }
  0x25   :  { %p1275_p1 = scmp.ne.s32.totalorder %s67_s13, %s1274_s17  ;;  %p1280_p3 = scmp.lt.s32.totalorder %s1274_s17, %s1274_s17 }
  0x27   :  { %p1281_p4 = por %p1280_p3, %p1279_p2 }
  0x29   :  { %p1282_p5 = pnand %p1281_p4, %p1275_p1 }
  0x2b   :  { %1285 = shalt.err (!%p1282_p5)
}
  0x2c   :  { %72 = dma.hbm_to_vmem [thread:$0]  %s1573_s6, 256, %s67_s13, [#allocation9], %s1316_s22, %s1316_s22, %s1317_s23  }
  0x2d   :  { %1306 = dma.done.wait [#allocation3], 256  }
  0x2e   :  { %1307 = vsyncadd [#allocation3], 4294967040 }
  0x2f   :  { %1308 = dma.done.wait [#allocation6], 272  }
  0x30   :  { %1309 = vsyncadd [#allocation6], 4294967024 }
  0x31   :  { %1310 = dma.done.wait [#allocation9], 256  }
  0x32   :  { %1311 = vsyncadd [#allocation9], 4294967040  ;;  %v1320_v0 = vmov 0.0   ;;  %vm1321_vm0 = vmmov 0   ;;  %v1164_v1 = vld [vmem:[#allocation2 + $0x8] sm:$0xff]   ;;  %v1165_v2 = vld [vmem:[#allocation5 + $0x8] sm:$0xff]   ;;  %v381_v16 = vlaneseq }
  0x33   :  { %1086 = vmatprep.subr.bf16.mxu0 %v1320_v0  ;;  %1090 = vmatprep.mubr.msk.bf16.mxu0 %vm1321_vm0, %v1320_v0  ;;  %v1166_v3 = vld [vmem:[#allocation2] sm:$0xff]   ;;  %v1167_v4 = vld [vmem:[#allocation5] sm:$0xff]   ;;  %vm124_vm1 = vcmask 261120   ;;  %v1415_v7 = vld [vmem:[%s1568_s1 + $0x8] sm:$0xff]   ;;  %v1322_v14 = vmov 1966171168  }
  0x34   :  { %1087 = vmatpush3.bf16.msra.mxu0 %v1164_v1  ;;  %1094 = vmatprep.subr.bf16.mxu1 %v1165_v2  ;;  %v1168_v5 = vld [vmem:[%s1568_s1] sm:$0xff]   ;;  %v1420_v8 = vld [vmem:[%s1568_s1 + $0x10] sm:$0xff]   ;;  %v477_v9 = vld [vmem:[%s1575_s8 + $0x18] sm:$0xff]  ;;  %v379_v15 = vunpack.c.l.s4 %v1322_v14  ;;  %v382_v18 = vshrl.u32 %v381_v16, 7  ;;  %vm785_vm2 = vcmask 1043456   ;;  %vm607_vm3 = vcmask 31744  }
  0x35   :  { %1088 = vmatprep.subr.bf16.mxu0 %v1320_v0  ;;  %1095 = vmatpush3.bf16.msra.mxu1 %v1165_v2  ;;  %v92_v6 = vld [vmem:[%s1567_s0] sm:$0xf]  ;;  %v1434_v10 = vld [vmem:[%s1568_s1 + $0x18] sm:$0xff]   ;;  %v476_v11 = vld [vmem:[%s1575_s8 + $0x10] sm:$0xff]  ;;  %vm966_vm4 = vcmask 1041409   ;;  %vm968_vm5 = vcmask 1042434  }
  0x36   :  { %1096 = vmatprep.subr.bf16.mxu1 %v1167_v4  ;;  %1098 = vmatprep.mubr.msk.bf16.mxu1 %vm124_vm1, %v1168_v5  ;;  %v475_v12 = vld [vmem:[%s1575_s8 + $0x8] sm:$0xff]  ;;  %v474_v13 = vld [vmem:[%s1575_s8] sm:$0xff]  ;;  %v380_v17 = vunpack.c.0.s8 %v379_v15  ;;  %v428_v27 = vsub.s32 0, %v382_v18  ;;  %vm970_vm6 = vcmask 1043459   ;;  %vm972_vm7 = vcmask 1044484  }
  0x37   :  { %v1011_v19 = vld [vmem:[%s1570_s3] ss:$0 sm:$0xff]  ;;  %vm974_vm8 = vcmask 1045509   ;;  %vm976_vm9 = vcmask 1046534   ;;  %vm978_vm10 = vcmask 1047559  }
  0x38   :  { %1089 = vmatpush3.bf16.msra.mxu0 %v1166_v3  ;;  %v383_v20 = vsub.s32 %v380_v17, %v382_v18  ;;  %v1015_v33 = vld [vmem:[#allocation7] ss:$0 sm:$0xff] }
  0x39   :  { %1097 = vmatpush3.bf16.msra.mxu1 %v1167_v4  ;;  %v760_v14 = vld [vmem:[%s1576_s9] sm:$0xf] }
  0x3a   :  { %1118 = vmatprep.subr.mxu1 %v477_v9 }
  0x3b   :  { %1091 = vmatmul.mubr.msk.bf16.vlgmr.msra.gmra.mxu0 %vm124_vm1, %v92_v6 }
  0x3c   :  { %1110 = vmatprep.mubr.msk.bf16.mxu0 %vm124_vm1, %v1168_v5  ;;  %1099 = vmatmul.mubr.msk.bf16.vlgmr.msra.gmra.mxu1 %vm124_vm1, %v1415_v7 }
  0x3d   :  { %1102 = vmatprep.mubr.msk.bf16.mxu1 %vm124_vm1, %v1420_v8  ;;  %1119 = vmatpush3.msra.mxu1 %v477_v9 }
  0x3e   :  { %1120 = vmatprep.subr.mxu1 %v476_v11 }
  0x3f   :  { %1121 = vmatpush3.msra.mxu1 %v476_v11 }
  0x40   :  { %1122 = vmatprep.subr.mxu1 %v475_v12 }
  0x41   :  { %1123 = vmatpush3.msra.mxu1 %v475_v12  ;;  %v1172_v12 = vld [vmem:[#allocation8 + $0x8] sm:$0xff]  }
  0x42   :  { %1124 = vmatprep.subr.mxu1 %v474_v13  ;;  %1106 = vmatprep.subr.bf16.mxu0 %v1172_v12 }
  0x43   :  { %1125 = vmatpush3.msra.mxu1 %v474_v13  ;;  %1107 = vmatpush3.bf16.msra.mxu0 %v1172_v12  ;;  %v1173_v13 = vld [vmem:[#allocation8] sm:$0xff]  }
  0x44   :  { %1103 = vmatmul.mubr.msk.bf16.gmra.mxu1 %vm124_vm1, %v1434_v10  ;;  %1108 = vmatprep.subr.bf16.mxu0 %v1173_v13 }
  0x45   :  { %1152 = vmatprep.subr.msk.mxu1 %vm785_vm2, %v760_v14 }
  0x47   :  { %1109 = vmatpush3.bf16.msra.mxu0 %v1173_v13 }
  0x48   :  { %1138 = vmatprep.subr.msk.mxu0 %vm785_vm2, %v760_v14 }
  0x4a   :  { %1111 = vmatmul.mubr.msk.bf16.vlgmr.msra.gmra.mxu0 %vm124_vm1, %v1415_v7 }
  0x4b   :  { %1114 = vmatprep.mubr.msk.bf16.mxu0 %vm124_vm1, %v1420_v8  ;;  %1139 = vmatpush3.msk.msra.mxu0 %vm785_vm2, %v760_v14 }
  0x52   :  { %1115 = vmatmul.mubr.msk.bf16.gmra.mxu0 %vm124_vm1, %v1434_v10 }
  0xfb   :  { %v162_v21 = vpop.f32.mrf.mxu0 }
  0xfc   :  { %v163_v22 = vadd.f32 %v1011_v19, %v162_v21  ;;  %v1100_v23 = vpop.f32.mrf.mxu1 }
  0xfd   :  { %v1092_v24 = vpop.f32.mrf.mxu0  ;;  %v266_v40 = vadd.f32 %v1100_v23, %v1015_v33 }
  0xfe   :  { %v377_v25 = vcombine.high %v163_v22, %v163_v22  ;;  %v384_v26 = vrot.slane %v163_v22, %v383_v20  ;;  %v257_v28 = vpop.f32.mrf.mxu1 }
  0xff   :  { %v165_v29 = vpop.f32.mrf.mxu0  ;;  %v258_v41 = vadd.f32 %v1015_v33, %v257_v28 }
 0x100   :  { %v391_v30 = vrot.slane %v377_v25, %v383_v20  ;;  %v392_v31 = vcombine.high %v384_v26, %v384_v26  ;;  %v400_v32 = vrot.slane %v384_v26, %v383_v20  ;;  %v1101_v34 = vpop.f32.mrf.mxu1 }
 0x101   :  { %v1093_v35 = vpop.f32.mrf.mxu0  ;;  %v269_v56 = vadd.f32 %v1101_v34, %v1015_v33 }
 0x102   :  { %v393_v36 = vcombine.high %v391_v30, %v391_v30  ;;  %v414_v37 = vrot.slane %v392_v31, %v383_v20  ;;  %v422_v38 = vcombine.high %v400_v32, %v400_v32  ;;  %v407_v39 = vrot.slane %v391_v30, %v383_v20  ;;  %v260_v43 = vpop.f32.mrf.mxu1 }
 0x103   :  { %v429_v42 = vrot.slane %v400_v32, %v428_v27  ;;  %v261_v46 = vadd.f32 %v1015_v33, %v260_v43 }
 0x104   :  { %v437_v44 = vrot.slane %v422_v38, %v428_v27  ;;  %v424_v45 = vcombine.high %v414_v37, %v414_v37  ;;  %v433_v47 = vrot.slane %v414_v37, %v428_v27  ;;  %v1104_v49 = vpop.f32.mrf.mxu1  ;;  %v421_v53 = vrot.slane %v393_v36, %v383_v20 }
 0x105   :  { %v466_v48 = vmul.f32 %v429_v42, %v258_v41  ;;  %v423_v54 = vcombine.high %v407_v39, %v407_v39  ;;  %v445_v58 = vrot.slane %v407_v39, %v428_v27  ;;  %v282_v62 = vadd.f32 %v1104_v49, %v1015_v33 }
 0x106   :  { %v468_v50 = vmul.f32 %v437_v44, %v266_v40  ;;  %v441_v51 = vrot.slane %v424_v45, %v428_v27  ;;  %v467_v52 = vmul.f32 %v433_v47, %v261_v46  ;;  %v273_v55 = vpop.f32.mrf.mxu1  ;;  %v425_v61 = vcombine.high %v421_v53, %v421_v53 }
 0x107   :  { %1126 = vmatprep.mubr.msk.f32.mxu1 %vm124_vm1, %v466_v48  ;;  %v274_v57 = vadd.f32 %v1015_v33, %v273_v55  ;;  %v453_v63 = vrot.slane %v423_v54, %v428_v27  ;;  %v449_v3 = vrot.slane %v421_v53, %v428_v27 }
 0x108   :  { %1127 = vmatmul.mubr.msk.f32.vlgmr.msra.gmra.mxu1 %vm124_vm1, %v467_v52  ;;  %v1105_v59 = vpop.f32.mrf.mxu1  ;;  %v469_v60 = vmul.f32 %v441_v51, %v269_v56  ;;  %v457_v5 = vrot.slane %v425_v61, %v428_v27 }
 0x109   :  { %1129 = vmatprep.mubr.msk.f32.mxu1 %vm124_vm1, %v468_v50  ;;  %v470_v0 = vmul.f32 %v445_v58, %v274_v57  ;;  %v285_v4 = vadd.f32 %v1105_v59, %v1015_v33  ;;  %v472_v9 = vmul.f32 %v453_v63, %v282_v62  ;;  %1153 = vmatpush3.msk.msra.mxu1 %vm785_vm2, %v760_v14 }
 0x10a   :  { %v276_v1 = vpop.f32.mrf.mxu1 }
 0x10b   :  { %v277_v2 = vadd.f32 %v1015_v33, %v276_v1  ;;  %v473_v11 = vmul.f32 %v457_v5, %v285_v4 }
 0x10c   :  { %1130 = vmatmul.mubr.msk.f32.gmra.mxu1 %vm124_vm1, %v469_v60 }
 0x10d   :  { %1132 = vmatprep.mubr.msk.f32.mxu1 %vm124_vm1, %v470_v0  ;;  %v471_v6 = vmul.f32 %v449_v3, %v277_v2 }
 0x110   :  { %1133 = vmatmul.mubr.msk.f32.gmra.mxu1 %vm124_vm1, %v471_v6 }
 0x111   :  { %1135 = vmatprep.mubr.msk.f32.mxu1 %vm124_vm1, %v472_v9 }
 0x114   :  { %1136 = vmatmul.mubr.msk.f32.gmra.mxu1 %vm124_vm1, %v473_v11 }
 0x1c8   :  { %v1128_v15 = vpop.f32.mrf.mxu1 }
 0x1c9   :  { %v615_v16 = vsel %vm607_vm3, %v1128_v15, -inf }
 0x1ca   :  { %v616_v7 = vrot.slane %v615_v16, 4  ;;  %v568_v17 = vpop.f32.mrf.mxu1 }
 0x1cb   :  { %v608_v8 = vsel %vm607_vm3, %v568_v17, -inf }
 0x1cc   :  { %v617_v18 = vmax.f32 %v615_v16, %v616_v7  ;;  %v609_v19 = vrot.slane %v608_v8, 4  ;;  %v1131_v10 = vpop.f32.mrf.mxu1 }
 0x1cd   :  { %v629_v20 = vsel %vm607_vm3, %v1131_v10, -inf }
 0x1ce   :  { %v618_v21 = vrot.slane %v617_v18, 2  ;;  %v610_v22 = vmax.f32 %v608_v8, %v609_v19  ;;  %v630_v23 = vrot.slane %v629_v20, 4  ;;  %v578_v24 = vpop.f32.mrf.mxu1 }
 0x1cf   :  { %v622_v25 = vsel %vm607_vm3, %v578_v24, -inf }
 0x1d0   :  { %v619_v26 = vmax.f32 %v617_v18, %v618_v21  ;;  %v611_v27 = vrot.slane %v610_v22, 2  ;;  %v631_v28 = vmax.f32 %v629_v20, %v630_v23  ;;  %v623_v29 = vrot.slane %v622_v25, 4  ;;  %v1134_v30 = vpop.f32.mrf.mxu1 }
 0x1d1   :  { %v643_v31 = vsel %vm607_vm3, %v1134_v30, -inf }
 0x1d2   :  { %v620_v32 = vrot.slane %v619_v26, 1  ;;  %v612_v33 = vmax.f32 %v610_v22, %v611_v27  ;;  %v632_v34 = vrot.slane %v631_v28, 2  ;;  %v624_v35 = vmax.f32 %v622_v25, %v623_v29  ;;  %v588_v36 = vpop.f32.mrf.mxu1 }
 0x1d3   :  { %v644_v37 = vrot.slane %v643_v31, 4  ;;  %v636_v38 = vsel %vm607_vm3, %v588_v36, -inf }
 0x1d4   :  { %v621_v39 = vmax.f32 %v619_v26, %v620_v32  ;;  %v613_v40 = vrot.slane %v612_v33, 1  ;;  %v633_v41 = vmax.f32 %v631_v28, %v632_v34  ;;  %v625_v42 = vrot.slane %v624_v35, 2  ;;  %v1137_v43 = vpop.f32.mrf.mxu1 }
 0x1d5   :  { %v645_v44 = vmax.f32 %v643_v31, %v644_v37  ;;  %v637_v45 = vrot.slane %v636_v38, 4  ;;  %v657_v46 = vsel %vm607_vm3, %v1137_v43, -inf }
 0x1d6   :  { %v665_v47 = vsub.f32 %v1128_v15, %v621_v39  ;;  %v614_v48 = vmax.f32 %v612_v33, %v613_v40  ;;  %v634_v49 = vrot.slane %v633_v41, 1  ;;  %v626_v50 = vmax.f32 %v624_v35, %v625_v42  ;;  %v598_v51 = vpop.f32.mrf.mxu1 }
 0x1d7   :  { %v646_v52 = vrot.slane %v645_v44, 2  ;;  %v638_v53 = vmax.f32 %v636_v38, %v637_v45  ;;  %v658_v54 = vrot.slane %v657_v46, 4  ;;  %v650_v55 = vsel %vm607_vm3, %v598_v51, -inf }
 0x1d8   :  { %v674_v56 = vmul.f32 1.442695, %v665_v47  ;;  %v664_v57 = vsub.f32 %v568_v17, %v614_v48  ;;  %v635_v58 = vmax.f32 %v633_v41, %v634_v49  ;;  %v627_v59 = vrot.slane %v626_v50, 1 }
 0x1d9   :  { %v647_v60 = vmax.f32 %v645_v44, %v646_v52  ;;  %v639_v61 = vrot.slane %v638_v53, 2  ;;  %v659_v62 = vmax.f32 %v657_v46, %v658_v54  ;;  %v651_v63 = vrot.slane %v650_v55, 4 }
 0x1da   :  { %1174 = vpow2.f32 %v674_v56  ;;  %v672_v0 = vmul.f32 1.442695, %v664_v57  ;;  %v667_v1 = vsub.f32 %v1131_v10, %v635_v58  ;;  %v628_v2 = vmax.f32 %v626_v50, %v627_v59 }
 0x1db   :  { %v648_v3 = vrot.slane %v647_v60, 1  ;;  %v640_v4 = vmax.f32 %v638_v53, %v639_v61  ;;  %v660_v5 = vrot.slane %v659_v62, 2  ;;  %v652_v6 = vmax.f32 %v650_v55, %v651_v63 }
 0x1dc   :  { %1176 = vpow2.f32 %v672_v0  ;;  %v678_v9 = vmul.f32 1.442695, %v667_v1  ;;  %v666_v11 = vsub.f32 %v578_v24, %v628_v2 }
 0x1dd   :  { %v649_v12 = vmax.f32 %v647_v60, %v648_v3  ;;  %v641_v13 = vrot.slane %v640_v4, 1  ;;  %v661_v14 = vmax.f32 %v659_v62, %v660_v5  ;;  %v653_v15 = vrot.slane %v652_v6, 2 }
 0x1de   :  { %1178 = vpow2.f32 %v678_v9  ;;  %v676_v16 = vmul.f32 1.442695, %v666_v11 }
 0x1df   :  { %v669_v7 = vsub.f32 %v1134_v30, %v649_v12  ;;  %v642_v17 = vmax.f32 %v640_v4, %v641_v13  ;;  %v662_v8 = vrot.slane %v661_v14, 1  ;;  %v654_v18 = vmax.f32 %v652_v6, %v653_v15 }
 0x1e0   :  { %1180 = vpow2.f32 %v676_v16 }
 0x1e1   :  { %v682_v19 = vmul.f32 1.442695, %v669_v7  ;;  %v668_v10 = vsub.f32 %v588_v36, %v642_v17  ;;  %v663_v20 = vmax.f32 %v661_v14, %v662_v8  ;;  %v655_v21 = vrot.slane %v654_v18, 1 }
 0x1e3   :  { %1182 = vpow2.f32 %v682_v19  ;;  %v680_v22 = vmul.f32 1.442695, %v668_v10  ;;  %v671_v23 = vsub.f32 %v1137_v43, %v663_v20  ;;  %v656_v25 = vmax.f32 %v654_v18, %v655_v21 }
 0x1e5   :  { %1184 = vpow2.f32 %v680_v22  ;;  %v686_v24 = vmul.f32 1.442695, %v671_v23  ;;  %v670_v26 = vsub.f32 %v598_v51, %v656_v25 }
 0x1e7   :  { %v1475_v27 = vpop.eup %1174  ;;  %1186 = vpow2.f32 %v686_v24  ;;  %v684_v28 = vmul.f32 1.442695, %v670_v26 }
 0x1e8   :  { %v695_v29 = vsel %vm607_vm3, %v1475_v27, 0.0 }
 0x1e9   :  { %v1479_v30 = vpop.eup %1176  ;;  %v696_v31 = vrot.slane %v695_v29, 4  ;;  %1188 = vpow2.f32 %v684_v28 }
 0x1ea   :  { %v688_v32 = vsel %vm607_vm3, %v1479_v30, 0.0 }
 0x1eb   :  { %v1483_v33 = vpop.eup %1178  ;;  %v697_v34 = vadd.f32 %v696_v31, %v695_v29  ;;  %v689_v35 = vrot.slane %v688_v32, 4 }
 0x1ec   :  { %v709_v36 = vsel %vm607_vm3, %v1483_v33, 0.0 }
 0x1ed   :  { %v1487_v37 = vpop.eup %1180  ;;  %v698_v38 = vrot.slane %v697_v34, 2  ;;  %v690_v39 = vadd.f32 %v689_v35, %v688_v32  ;;  %v710_v40 = vrot.slane %v709_v36, 4 }
 0x1ee   :  { %v702_v41 = vsel %vm607_vm3, %v1487_v37, 0.0 }
 0x1ef   :  { %v699_v42 = vadd.f32 %v698_v38, %v697_v34  ;;  %v691_v43 = vrot.slane %v690_v39, 2  ;;  %v711_v44 = vadd.f32 %v710_v40, %v709_v36  ;;  %v703_v45 = vrot.slane %v702_v41, 4 }
 0x1f0   :  { %v1491_v46 = vpop.eup %1182 }
 0x1f1   :  { %v700_v47 = vrot.slane %v699_v42, 1  ;;  %v692_v48 = vadd.f32 %v691_v43, %v690_v39  ;;  %v712_v49 = vrot.slane %v711_v44, 2  ;;  %v704_v50 = vadd.f32 %v703_v45, %v702_v41 }
 0x1f2   :  { %v1493_v51 = vpop.eup %1184  ;;  %v723_v52 = vsel %vm607_vm3, %v1491_v46, 0.0 }
 0x1f3   :  { %v701_v53 = vadd.f32 %v700_v47, %v699_v42  ;;  %v693_v54 = vrot.slane %v692_v48, 1  ;;  %v713_v55 = vadd.f32 %v712_v49, %v711_v44  ;;  %v705_v56 = vrot.slane %v704_v50, 2  ;;  %v1112_v44 = vpop.f32.mrf.mxu0 }
 0x1f4   :  { %v1497_v57 = vpop.eup %1186  ;;  %v724_v58 = vrot.slane %v723_v52, 4  ;;  %v716_v59 = vsel %vm607_vm3, %v1493_v51, 0.0 }
 0x1f5   :  { %1190 = vrcp.f32 %v701_v53  ;;  %v694_v60 = vadd.f32 %v693_v54, %v692_v48  ;;  %v714_v61 = vrot.slane %v713_v55, 1  ;;  %v706_v62 = vadd.f32 %v705_v56, %v704_v50  ;;  %v345_v45 = vpop.f32.mrf.mxu0 }
 0x1f6   :  { %v1189_v63 = vpop.eup %1188  ;;  %v725_v0 = vadd.f32 %v724_v58, %v723_v52  ;;  %v717_v1 = vrot.slane %v716_v59, 4  ;;  %v737_v2 = vsel %vm607_vm3, %v1497_v57, 0.0 }
 0x1f7   :  { %v715_v3 = vadd.f32 %v714_v61, %v713_v55  ;;  %v707_v4 = vrot.slane %v706_v62, 1  ;;  %v738_v5 = vrot.slane %v737_v2, 4  ;;  %v730_v6 = vsel %vm607_vm3, %v1189_v63, 0.0 }
 0x1f8   :  { %v726_v9 = vrot.slane %v725_v0, 2  ;;  %v718_v11 = vadd.f32 %v717_v1, %v716_v59  ;;  %v731_v12 = vrot.slane %v730_v6, 4  ;;  %1192 = vrcp.f32 %v694_v60 }
 0x1f9   :  { %v708_v13 = vadd.f32 %v707_v4, %v706_v62  ;;  %v739_v14 = vadd.f32 %v738_v5, %v737_v2  ;;  %1194 = vrcp.f32 %v715_v3 }
 0x1fa   :  { %v727_v15 = vadd.f32 %v726_v9, %v725_v0  ;;  %v719_v16 = vrot.slane %v718_v11, 2  ;;  %v732_v7 = vadd.f32 %v731_v12, %v730_v6 }
 0x1fb   :  { %v740_v17 = vrot.slane %v739_v14, 2  ;;  %1196 = vrcp.f32 %v708_v13 }
 0x1fc   :  { %v728_v8 = vrot.slane %v727_v15, 1  ;;  %v720_v18 = vadd.f32 %v719_v16, %v718_v11  ;;  %v733_v19 = vrot.slane %v732_v7, 2 }
 0x1fd   :  { %v741_v10 = vadd.f32 %v740_v17, %v739_v14 }
 0x1fe   :  { %v729_v20 = vadd.f32 %v728_v8, %v727_v15  ;;  %v721_v21 = vrot.slane %v720_v18, 1  ;;  %v734_v22 = vadd.f32 %v733_v19, %v732_v7 }
 0x1ff   :  { %v742_v23 = vrot.slane %v741_v10, 1 }
 0x200   :  { %v722_v25 = vadd.f32 %v721_v21, %v720_v18  ;;  %v735_v24 = vrot.slane %v734_v22, 1  ;;  %1198 = vrcp.f32 %v729_v20 }
 0x201   :  { %v743_v26 = vadd.f32 %v742_v23, %v741_v10 }
 0x202   :  { %v1191_v28 = vpop.eup %1190  ;;  %v736_v29 = vadd.f32 %v735_v24, %v734_v22  ;;  %1200 = vrcp.f32 %v722_v25 }
 0x203   :  { %v747_v31 = vmul.f32 %v1191_v28, %v1475_v27  ;;  %1202 = vrcp.f32 %v743_v26 }
 0x204   :  { %1204 = vrcp.f32 %v736_v29 }
 0x205   :  { %v1193_v32 = vpop.eup %1192  ;;  %983 = vst.msk [vmem:[%s1578_s11 + $0x8] sm:$0xff] %vm607_vm3, %v747_v31 }
 0x206   :  { %v1195_v34 = vpop.eup %1194  ;;  %v745_v35 = vmul.f32 %v1193_v32, %v1479_v30 }
 0x207   :  { %v751_v36 = vmul.f32 %v1195_v34, %v1483_v33 }
 0x208   :  { %v1197_v38 = vpop.eup %1196  ;;  %1140 = vmatprep.mubr.msk.f32.mxu0 %vm607_vm3, %v745_v35  ;;  %982 = vst.msk [vmem:[%s1578_s11] sm:$0xff] %vm607_vm3, %v745_v35 }
 0x209   :  { %1141 = vmatmul.mubr.msk.f32.vlgmr.msra.gmra.mxu0 %vm607_vm3, %v747_v31  ;;  %v749_v27 = vmul.f32 %v1197_v38, %v1487_v37  ;;  %985 = vst.msk [vmem:[%s1578_s11 + $0x18] sm:$0xff] %vm607_vm3, %v751_v36 }
 0x20b   :  { %1143 = vmatprep.mubr.msk.f32.mxu0 %vm607_vm3, %v749_v27  ;;  %984 = vst.msk [vmem:[%s1578_s11 + $0x10] sm:$0xff] %vm607_vm3, %v749_v27 }
 0x20d   :  { %v1199_v30 = vpop.eup %1198  ;;  %1144 = vmatmul.mubr.msk.f32.gmra.mxu0 %vm607_vm3, %v751_v36 }
 0x20e   :  { %v755_v33 = vmul.f32 %v1199_v30, %v1491_v46  ;;  %v1113_v46 = vpop.f32.mrf.mxu0 }
 0x20f   :  { %v1201_v39 = vpop.eup %1200 }
 0x210   :  { %v1203_v40 = vpop.eup %1202  ;;  %v753_v37 = vmul.f32 %v1201_v39, %v1493_v51  ;;  %987 = vst.msk [vmem:[%s1578_s11 + $0x28] sm:$0xff] %vm607_vm3, %v755_v33  ;;  %v348_v47 = vpop.f32.mrf.mxu0  ;;  %v1026_v51 = vld [vmem:[%s1574_s7] ss:$0 sm:$0xff]  ;;  %s1323_s7 = smov [#allocation10]  }
 0x211   :  { %v1205_v41 = vpop.eup %1204  ;;  %v759_v42 = vmul.f32 %v1203_v40, %v1497_v57  ;;  %v349_v53 = vadd.f32 %v1026_v51, %v348_v47  ;;  %v346_v55 = vadd.f32 %v1026_v51, %v345_v45  ;;  %v357_v58 = vadd.f32 %v1113_v46, %v1026_v51 }
 0x212   :  { %1146 = vmatprep.mubr.msk.f32.mxu0 %vm607_vm3, %v753_v37  ;;  %986 = vst.msk [vmem:[%s1578_s11 + $0x20] sm:$0xff] %vm607_vm3, %v753_v37  ;;  %v757_v43 = vmul.f32 %v1205_v41, %v1189_v63  ;;  %v1116_v48 = vpop.f32.mrf.mxu0  ;;  %v354_v63 = vadd.f32 %v1112_v44, %v1026_v51 }
 0x213   :  { %989 = vst.msk [vmem:[%s1578_s11 + $0x38] sm:$0xff] %vm607_vm3, %v759_v42  ;;  %1147 = vmatmul.mubr.msk.f32.gmra.mxu0 %vm607_vm3, %v755_v33  ;;  %v370_v10 = vadd.f32 %v1116_v48, %v1026_v51 }
 0x214   :  { %1149 = vmatprep.mubr.msk.f32.mxu1 %vm607_vm3, %v757_v43  ;;  %988 = vst.msk [vmem:[%s1578_s11 + $0x30] sm:$0xff] %vm607_vm3, %v757_v43  ;;  %v361_v49 = vpop.f32.mrf.mxu0  ;;  %s996_s11 = sshll.u32 %s1323_s7, 4  ;;  %s997_s11 = int_to_ptr.vmem [resolvable:$true] %s996_s11 }
 0x215   :  { %1150 = vmatmul.mubr.msk.f32.vlgmr.msra.gmra.mxu1 %vm607_vm3, %v759_v42  ;;  %v362_v8 = vadd.f32 %v1026_v51, %v361_v49  ;;  %s1286_s28 = scalar_lea.vmem %s997_s11, 128  ;;  %p1291_p7 = scmp.lt.s32.totalorder %s997_s11, %s997_s11 }
 0x216   :  { %v1117_v50 = vpop.f32.mrf.mxu0  ;;  %p1287_p6 = scmp.ne.s32.totalorder %s997_s11, %s1286_s28  ;;  %p1292_p8 = scmp.lt.s32.totalorder %s1286_s28, %s1286_s28 }
 0x217   :  { %v373_v18 = vadd.f32 %v1117_v50, %v1026_v51 }
 0x218   :  { %v364_v52 = vpop.f32.mrf.mxu0  ;;  %p1293_p9 = por %p1292_p8, %p1291_p7 }
 0x219   :  { %v365_v13 = vadd.f32 %v1026_v51, %v364_v52 }
 0x21a   :  { %p1294_p10 = pnand %p1293_p9, %p1287_p6 }
 0x2c9   :  { %v1142_v54 = vpop.f32.mrf.mxu0 }
 0x2ca   :  { %v895_v56 = vmul.f32 %v1142_v54, %v349_v53 }
 0x2cb   :  { %v855_v57 = vpop.f32.mrf.mxu0 }
 0x2cc   :  { %v909_v59 = vsel %vm124_vm1, %v895_v56, 0.0  ;;  %v894_v60 = vmul.f32 %v855_v57, %v346_v55 }
 0x2cd   :  { %v910_v61 = vrot.slane %v909_v59, 4  ;;  %v1145_v62 = vpop.f32.mrf.mxu0 }
 0x2ce   :  { %v902_v0 = vsel %vm124_vm1, %v894_v60, 0.0  ;;  %v897_v1 = vmul.f32 %v1145_v62, %v357_v58 }
 0x2cf   :  { %v911_v2 = vadd.f32 %v910_v61, %v909_v59  ;;  %v903_v3 = vrot.slane %v902_v0, 4  ;;  %v865_v4 = vpop.f32.mrf.mxu0 }
 0x2d0   :  { %v923_v5 = vsel %vm124_vm1, %v897_v1, 0.0  ;;  %v896_v6 = vmul.f32 %v865_v4, %v354_v63 }
 0x2d1   :  { %v912_v9 = vrot.slane %v911_v2, 2  ;;  %v904_v11 = vadd.f32 %v903_v3, %v902_v0  ;;  %v924_v12 = vrot.slane %v923_v5, 4 }
 0x2d2   :  { %v916_v14 = vsel %vm124_vm1, %v896_v6, 0.0 }
 0x2d3   :  { %v905_v15 = vrot.slane %v904_v11, 2  ;;  %v925_v16 = vadd.f32 %v924_v12, %v923_v5  ;;  %v917_v7 = vrot.slane %v916_v14, 4  ;;  %v1148_v17 = vpop.f32.mrf.mxu0  ;;  %v913_v20 = vadd.f32 %v912_v9, %v911_v2 }
 0x2d4   :  { %v899_v19 = vmul.f32 %v1148_v17, %v365_v13 }
 0x2d5   :  { %v906_v21 = vadd.f32 %v905_v15, %v904_v11  ;;  %v918_v22 = vadd.f32 %v917_v7, %v916_v14  ;;  %v875_v23 = vpop.f32.mrf.mxu0  ;;  %v1151_v25 = vpop.f32.mrf.mxu1  ;;  %v926_v24 = vrot.slane %v925_v16, 2  ;;  %v914_v30 = vrot.slane %v913_v20, 1 }
 0x2d6   :  { %v937_v26 = vsel %vm124_vm1, %v899_v19, 0.0  ;;  %v898_v28 = vmul.f32 %v875_v23, %v362_v8  ;;  %v901_v29 = vmul.f32 %v1151_v25, %v373_v18 }
 0x2d7   :  { %v907_v31 = vrot.slane %v906_v21, 1  ;;  %v919_v32 = vrot.slane %v918_v22, 2  ;;  %v885_v34 = vpop.f32.mrf.mxu1  ;;  %v938_v35 = vrot.slane %v937_v26, 4  ;;  %v927_v40 = vadd.f32 %v926_v24, %v925_v16 }
 0x2d8   :  { %v930_v36 = vsel %vm124_vm1, %v898_v28, 0.0  ;;  %v951_v38 = vsel %vm124_vm1, %v901_v29, 0.0  ;;  %v900_v27 = vmul.f32 %v885_v34, %v370_v10  ;;  %v915_v49 = vadd.f32 %v914_v30, %v913_v20 }
 0x2d9   :  { %v920_v33 = vadd.f32 %v919_v32, %v918_v22  ;;  %v931_v39 = vrot.slane %v930_v36, 4  ;;  %v939_v37 = vadd.f32 %v938_v35, %v937_v26  ;;  %v952_v41 = vrot.slane %v951_v38, 4 }
 0x2da   :  { %v944_v42 = vsel %vm124_vm1, %v900_v27, 0.0  ;;  %v908_v45 = vadd.f32 %v907_v31, %v906_v21  ;;  %v928_v52 = vrot.slane %v927_v40, 1 }
 0x2db   :  { %v921_v43 = vrot.slane %v920_v33, 1  ;;  %v932_v44 = vadd.f32 %v931_v39, %v930_v36  ;;  %v940_v46 = vrot.slane %v939_v37, 2  ;;  %v953_v47 = vadd.f32 %v952_v41, %v951_v38 }
 0x2dc   :  { %v945_v48 = vrot.slane %v944_v42, 4  ;;  %v967_v57 = vsel %vm966_vm4, %v915_v49, %v908_v45  ;;  %v929_v63 = vadd.f32 %v928_v52, %v927_v40 }
 0x2dd   :  { %v922_v50 = vadd.f32 %v921_v43, %v920_v33  ;;  %v933_v51 = vrot.slane %v932_v44, 2  ;;  %v941_v53 = vadd.f32 %v940_v46, %v939_v37  ;;  %v954_v54 = vrot.slane %v953_v47, 2 }
 0x2de   :  { %v946_v55 = vadd.f32 %v945_v48, %v944_v42 }
 0x2df   :  { %v934_v56 = vadd.f32 %v933_v51, %v932_v44  ;;  %v955_v58 = vadd.f32 %v954_v54, %v953_v47  ;;  %v969_v60 = vsel %vm968_vm5, %v922_v50, %v967_v57  ;;  %v942_v61 = vrot.slane %v941_v53, 1 }
 0x2e0   :  { %v947_v59 = vrot.slane %v946_v55, 2  ;;  %v971_v4 = vsel %vm970_vm6, %v929_v63, %v969_v60 }
 0x2e1   :  { %v935_v62 = vrot.slane %v934_v56, 1  ;;  %v956_v2 = vrot.slane %v955_v58, 1  ;;  %v943_v5 = vadd.f32 %v942_v61, %v941_v53 }
 0x2e2   :  { %v948_v0 = vadd.f32 %v947_v59, %v946_v55 }
 0x2e3   :  { %v936_v1 = vadd.f32 %v935_v62, %v934_v56  ;;  %v957_v11 = vadd.f32 %v956_v2, %v955_v58 }
 0x2e4   :  { %v949_v3 = vrot.slane %v948_v0, 1 }
 0x2e5   :  { %v973_v6 = vsel %vm972_vm7, %v936_v1, %v971_v4 }
 0x2e6   :  { %v950_v9 = vadd.f32 %v949_v3, %v948_v0  ;;  %v975_v12 = vsel %vm974_vm8, %v943_v5, %v973_v6 }
 0x2e8   :  { %v977_v13 = vsel %vm976_vm9, %v950_v9, %v975_v12 }
 0x2e9   :  { %v979_v14 = vsel %vm978_vm10, %v957_v11, %v977_v13 }
 0x2ea   :  { %981 = vst.msk [vmem:[#allocation10] sm:$0xff] %vm124_vm1, %v979_v14 }
 0x2eb   :  { %1297 = shalt.err (!%p1294_p10)
}
 0x2ec   :  { %999 = dma.vmem_to_hbm [thread:$0]  %s997_s11, 128, %s1577_s10, [#allocation4]  }
 0x2ed   :  { %1312 = dma.done.wait [#allocation4], 128  }
 0x2ee   :  { %1313 = vsyncadd [#allocation4], 4294967168 }
 0x2ef   :  { %1007 = vsyncpa [#allocation3], 1 }
 0x2f0   :  { %1008 = vsyncpa [#allocation6], 1 }
 0x2f1   :  { %1009 = vsyncpa [#allocation9], 1 }
 0x2f2   :  { %1010 = vsyncpa [#allocation4], 1 }

</bundles_post_ra>
